<compile_context>
chip_gen: v7x
topology: tpu7x:2x2x1
jax: 0.10.0
libtpu: 0.0.40
codegen_flags: <defaults>
</compile_context>

<pallas_src>
import functools

import jax
import jax.numpy as jnp
from jax.experimental import pallas as pl
from jax.experimental.pallas import tpu as pltpu

BN_EPS = 1e-5
SUBLANE = 8
VMEM_LIMIT = 48 * 1024 * 1024          # safe on v7x (64 MiB phys), generous on v5e/v6e
TILE_VMEM_BUDGET = 24 * 1024 * 1024    # cap on the per-step pipelined working set


def _round_up(v, m):
    return (v + m - 1) // m * m


def _cdiv(a, b):
    return (a + b - 1) // b


# ---------------------------------------------------------------------------
# Kernel 1: h = relu(x @ W1 + b1) (bf16 writeback) + global BatchNorm statistics.
# Grid (splits, tiles): `splits` is a parallel axis (one partial accumulator per
# core on v7x); the tile axis is "arbitrary" and accumulates column sum / ssq.
# ---------------------------------------------------------------------------
def _bn_stats_kernel(x_ref, w1_ref, b1_ref, h_ref, sum_ref, ssq_ref, *,
                     batch, tile_b, tiles_per_split):
    split = pl.program_id(0)
    step = pl.program_id(1)

    @pl.when(step == 0)
    def _init():
        sum_ref[...] = jnp.zeros_like(sum_ref)
        ssq_ref[...] = jnp.zeros_like(ssq_ref)

    x = x_ref[...].astype(jnp.bfloat16)                      # bf16 MXU operands
    h = jnp.dot(x, w1_ref[...], preferred_element_type=jnp.float32) + b1_ref[...]
    h = jnp.maximum(h, 0.0)
    h_ref[...] = h.astype(h_ref.dtype)                       # bf16 handoff to pass 2

    # Mask batch-padding rows so the statistics cover exactly `batch` rows.
    row0 = (split * tiles_per_split + step) * tile_b
    row = jax.lax.broadcasted_iota(jnp.int32, h.shape, 0) + row0
    hm = jnp.where(row < batch, h, 0.0)
    sum_ref[...] += jnp.sum(hm, axis=0, keepdims=True)
    ssq_ref[...] += jnp.sum(hm * hm, axis=0, keepdims=True)


# ---------------------------------------------------------------------------
# Kernel 2: rest of the forward pass for one batch tile, consuming the cached h
# and the precomputed BN scale/shift.  All matmuls: bf16 operands, f32 accumulate.
# ---------------------------------------------------------------------------
def _ae_forward_kernel(
    h_ref, scale_ref, shift_ref,
    w2_ref, b2_ref, w3_ref, b3_ref,
    w4_ref, b4_ref, w5_ref, b5_ref,
    w6_ref, b6_ref,
    recon_ref, emb_ref,
):
    bf16 = jnp.bfloat16

    # BatchNorm1d(128): global-batch scale/shift fused into a single FMA.
    h = h_ref[...].astype(jnp.float32) * scale_ref[...] + shift_ref[...]

    # Linear(128, 64) + ReLU
    h = jnp.dot(h.astype(bf16), w2_ref[...], preferred_element_type=jnp.float32) + b2_ref[...]
    h = jnp.maximum(h, 0.0)

    # Linear(64, 32) -> embeddings (stored directly at 32 lanes)
    emb = jnp.dot(h.astype(bf16), w3_ref[...], preferred_element_type=jnp.float32) + b3_ref[...]
    emb_ref[...] = emb.astype(emb_ref.dtype)

    # decoder: Linear(32, 64) + ReLU
    d = jnp.dot(emb.astype(bf16), w4_ref[...], preferred_element_type=jnp.float32) + b4_ref[...]
    d = jnp.maximum(d, 0.0)

    # Linear(64, 128) + ReLU
    d = jnp.dot(d.astype(bf16), w5_ref[...], preferred_element_type=jnp.float32) + b5_ref[...]
    d = jnp.maximum(d, 0.0)

    # Linear(128, D) -> reconstruction (exact feature width, no padding/slicing).
    recon = jnp.dot(d.astype(bf16), w6_ref[...], preferred_element_type=jnp.float32) + b6_ref[...]
    recon_ref[...] = recon.astype(recon_ref.dtype)


def autoencoder_forward(x, params, block_b=1024):
    """Autoencoder forward: x (B, D) f32 -> (recon (B, D) f32, emb (B, 32) f32)."""
    (w1, b1, gamma, beta, w2, b2, w3, b3, w4, b4, w5, b5, w6, b6) = params
    batch, input_dim = x.shape

    # --- tile-size selection: keep double-buffered per-step bytes inside budget ---
    batch8 = _round_up(batch, SUBLANE)
    per_row_bytes = 8 * input_dim + 1024        # f32 x in + f32 recon out + h/emb, x2-buffered
    tb = min(block_b, batch8, max(SUBLANE, TILE_VMEM_BUDGET // per_row_bytes))
    tb = max(SUBLANE, (tb // SUBLANE) * SUBLANE)

    n_tiles = _cdiv(batch8, tb)
    splits = 2 if n_tiles >= 2 else 1           # 2 partial stat accumulators (v7x dual-TC)
    tiles_per_split = _cdiv(n_tiles, splits)
    n_tiles = splits * tiles_per_split
    b_pad = n_tiles * tb

    x_p = x if b_pad == batch else jnp.pad(x, ((0, b_pad - batch), (0, 0)))

    # weights pre-cast to bf16 (tiny arrays; activations cast in-kernel)
    w1_b = w1.astype(jnp.bfloat16)
    w2_b = w2.astype(jnp.bfloat16)
    w3_b = w3.astype(jnp.bfloat16)
    w4_b = w4.astype(jnp.bfloat16)
    w5_b = w5.astype(jnp.bfloat16)
    w6_b = w6.astype(jnp.bfloat16)

    # --- pass 1: h = relu(x @ W1 + b1) + global BN statistics -------------------
    stats_kernel = functools.partial(
        _bn_stats_kernel, batch=batch, tile_b=tb, tiles_per_split=tiles_per_split)

    flops1 = 2 * b_pad * input_dim * 128
    bytes1 = (b_pad * input_dim * 4 + b_pad * 128 * 2
              + input_dim * 128 * 2 + 4 * 128 * 4)

    h_bf, psum, pssq = pl.pallas_call(
        stats_kernel,
        grid=(splits, tiles_per_split),
        in_specs=[
            pl.BlockSpec((tb, input_dim), lambda c, i: (c * tiles_per_split + i, 0)),
            pl.BlockSpec((input_dim, 128), lambda c, i: (0, 0)),   # w1 (bf16)
            pl.BlockSpec((1, 128), lambda c, i: (0, 0)),           # b1
        ],
        out_specs=(
            pl.BlockSpec((tb, 128), lambda c, i: (c * tiles_per_split + i, 0)),  # h
            pl.BlockSpec((1, 128), lambda c, i: (c, 0)),           # partial sum
            pl.BlockSpec((1, 128), lambda c, i: (c, 0)),           # partial ssq
        ),
        out_shape=(
            jax.ShapeDtypeStruct((b_pad, 128), jnp.bfloat16),
            jax.ShapeDtypeStruct((splits, 128), jnp.float32),
            jax.ShapeDtypeStruct((splits, 128), jnp.float32),
        ),
        compiler_params=pltpu.CompilerParams(
            dimension_semantics=("parallel", "arbitrary"),
            vmem_limit_bytes=VMEM_LIMIT,
        ),
        cost_estimate=pl.CostEstimate(flops=flops1, transcendentals=0,
                                      bytes_accessed=bytes1),
    )(x_p, w1_b, b1)

    # --- BN scale/shift in plain XLA (tiny (1,128) math) -----------------------
    inv_b = jnp.float32(1.0 / batch)
    mean = jnp.sum(psum, axis=0, keepdims=True) * inv_b
    ex2 = jnp.sum(pssq, axis=0, keepdims=True) * inv_b
    var = jnp.maximum(ex2 - mean * mean, 0.0)   # clamp fp cancellation
    scale = gamma * jax.lax.rsqrt(var + BN_EPS)
    shift = beta - mean * scale

    # --- pass 2: BN + remaining layers, batch-parallel grid ---------------------
    flops2 = 2 * b_pad * (128 * 64 + 64 * 32 + 32 * 64 + 64 * 128 + 128 * input_dim)
    bytes2 = (b_pad * 128 * 2 + b_pad * input_dim * 4 + b_pad * 32 * 4
              + 2 * (128 * 64 + 64 * 32 + 32 * 64 + 64 * 128 + 128 * input_dim)
              + 8 * 128 * 4)

    recon_p, emb_p = pl.pallas_call(
        _ae_forward_kernel,
        grid=(n_tiles,),
        in_specs=[
            pl.BlockSpec((tb, 128), lambda i: (i, 0)),             # h (bf16)
            pl.BlockSpec((1, 128), lambda i: (0, 0)),              # BN scale
            pl.BlockSpec((1, 128), lambda i: (0, 0)),              # BN shift
            pl.BlockSpec((128, 64), lambda i: (0, 0)),             # w2
            pl.BlockSpec((1, 64), lambda i: (0, 0)),               # b2
            pl.BlockSpec((64, 32), lambda i: (0, 0)),              # w3
            pl.BlockSpec((1, 32), lambda i: (0, 0)),               # b3
            pl.BlockSpec((32, 64), lambda i: (0, 0)),              # w4
            pl.BlockSpec((1, 64), lambda i: (0, 0)),               # b4
            pl.BlockSpec((64, 128), lambda i: (0, 0)),             # w5
            pl.BlockSpec((1, 128), lambda i: (0, 0)),              # b5
            pl.BlockSpec((128, input_dim), lambda i: (0, 0)),      # w6
            pl.BlockSpec((1, input_dim), lambda i: (0, 0)),        # b6
        ],
        out_specs=(
            pl.BlockSpec((tb, input_dim), lambda i: (i, 0)),       # recon
            pl.BlockSpec((tb, 32), lambda i: (i, 0)),              # emb
        ),
        out_shape=(
            jax.ShapeDtypeStruct((b_pad, input_dim), jnp.float32),
            jax.ShapeDtypeStruct((b_pad, 32), jnp.float32),
        ),
        compiler_params=pltpu.CompilerParams(
            dimension_semantics=("parallel",),
            vmem_limit_bytes=VMEM_LIMIT,
        ),
        cost_estimate=pl.CostEstimate(flops=flops2, transcendentals=0,
                                      bytes_accessed=bytes2),
    )(h_bf, scale, shift, w2_b, b2, w3_b, b3, w4_b, b4, w5_b, b5, w6_b, b6)

    if b_pad == batch:
        return recon_p, emb_p
    return recon_p[:batch], emb_p[:batch]


autoencoder_forward = jax.jit(autoencoder_forward, static_argnames=("block_b",))


# ---------------------------------------------------------------------------
# Parameter init (PyTorch nn.Linear defaults) and a pure-JAX reference mirroring
# the kernel's numerical recipe (bf16 MXU operands, fused BN, bf16 h handoff).
# ---------------------------------------------------------------------------
def _linear_init(key, fan_in, fan_out):
    kw, kb = jax.random.split(key)
    bound = 1.0 / jnp.sqrt(jnp.float32(fan_in))
    w = jax.random.uniform(kw, (fan_in, fan_out), jnp.float32, -bound, bound)
    b = jax.random.uniform(kb, (1, fan_out), jnp.float32, -bound, bound)
    return w, b


def _init_params(key, input_dim):
    keys = jax.random.split(key, 6)
    w1, b1 = _linear_init(keys[0], input_dim, 128)
    gamma = jnp.ones((1, 128), jnp.float32)   # BatchNorm1d defaults
    beta = jnp.zeros((1, 128), jnp.float32)
    w2, b2 = _linear_init(keys[1], 128, 64)
    w3, b3 = _linear_init(keys[2], 64, 32)
    w4, b4 = _linear_init(keys[3], 32, 64)
    w5, b5 = _linear_init(keys[4], 64, 128)
    w6, b6 = _linear_init(keys[5], 128, input_dim)
    return (w1, b1, gamma, beta, w2, b2, w3, b3, w4, b4, w5, b5, w6, b6)


def _reference_forward(x, params):
    (w1, b1, gamma, beta, w2, b2, w3, b3, w4, b4, w5, b5, w6, b6) = params
    bf = jnp.bfloat16

    def lin(a, w, b):
        return jnp.dot(a.astype(bf), w.astype(bf),
                       preferred_element_type=jnp.float32) + b

    h = jnp.maximum(lin(x, w1, b1), 0.0)
    n = x.shape[0]
    mean = jnp.sum(h, axis=0, keepdims=True) / n
    var = jnp.maximum(jnp.sum(h * h, axis=0, keepdims=True) / n - mean * mean, 0.0)
    scale = gamma * jax.lax.rsqrt(var + BN_EPS)
    shift = beta - mean * scale
    hn = h.astype(bf).astype(jnp.float32) * scale + shift   # mirrors bf16 h handoff
    h2 = jnp.maximum(lin(hn, w2, b2), 0.0)
    emb = lin(h2, w3, b3)
    d = jnp.maximum(lin(emb, w4, b4), 0.0)
    d = jnp.maximum(lin(d, w5, b5), 0.0)
    recon = lin(d, w6, b6)
    return recon, emb


if __name__ == "__main__":
    # Small deterministic shapes: batch=8, input_dim=64 (stand-in for the
    # pipeline-derived feature dim).
    batch, input_dim = 8, 64

    key = jax.random.PRNGKey(0)
    k_x, k_p = jax.random.split(key)
    x = jax.random.normal(k_x, (batch, input_dim), jnp.float32)
    params = _init_params(k_p, input_dim)

    recon, emb = autoencoder_forward(x, params)
    jax.block_until_ready((recon, emb))

    assert recon.shape == (batch, input_dim)
    assert emb.shape == (batch, 32)

    # Validate the Pallas translation against an XLA reference using the same
    # bf16-matmul / fused-BN recipe (bf16 vs pure-f32 drift is expected & small).
    r_ref, e_ref = _reference_forward(x, params)
    assert jnp.allclose(recon, r_ref, atol=3e-2, rtol=3e-2)
    assert jnp.allclose(emb, e_ref, atol=3e-2, rtol=3e-2)

    print("KERNEL_OK")
</pallas_src>

<mosaic_0001>
module attributes {stable_mosaic.version = 11 : i64} {
  func.func @_bn_stats_kernel(%arg0: i32, %arg1: i32, %arg2: memref<8x64xf32, #tpu.memory_space<vmem>>, %arg3: memref<64x128xbf16, #tpu.memory_space<vmem>>, %arg4: memref<1x128xf32, #tpu.memory_space<vmem>>, %arg5: memref<8x128xbf16, #tpu.memory_space<vmem>>, %arg6: memref<1x128xf32, #tpu.memory_space<vmem>>, %arg7: memref<1x128xf32, #tpu.memory_space<vmem>>) attributes {dimension_semantics = [#tpu.dimension_semantics<parallel>, #tpu.dimension_semantics<arbitrary>], iteration_bounds = array<i64: 1, 1>, scalar_prefetch = 0 : i64, scratch_operands = 0 : i64, tpu.core_type = #tpu.core_type<tc>, window_params = [{transform_indices = @transform_0, window_bounds = array<i64: 8, 64>}, {pipeline_mode = #tpu.pipeline_mode<synchronous>, transform_indices = @transform_1, window_bounds = array<i64: 64, 128>}, {pipeline_mode = #tpu.pipeline_mode<synchronous>, transform_indices = @transform_2, window_bounds = array<i64: 1, 128>}, {transform_indices = @transform_3, window_bounds = array<i64: 8, 128>}, {transform_indices = @transform_4, window_bounds = array<i64: 1, 128>}, {transform_indices = @transform_5, window_bounds = array<i64: 1, 128>}]} {
    %c0_i32 = arith.constant 0 : i32
    %0 = arith.cmpi eq, %arg1, %c0_i32 : i32
    %1 = arith.extui %0 : i1 to i32
    %c0_i32_0 = arith.constant 0 : i32
    %2 = arith.cmpi ne, %1, %c0_i32_0 : i32
    scf.if %2 {
      %cst_21 = arith.constant 0.000000e+00 : f32
      %35 = vector.broadcast %cst_21 : f32 to vector<1x128xf32>
      %c0_22 = arith.constant 0 : index
      %c0_23 = arith.constant 0 : index
      %36 = vector.load %arg6[%c0_22, %c0_23] : memref<1x128xf32, #tpu.memory_space<vmem>>, vector<1x128xf32>
      tpu.vector_store %arg6[%c0_22, %c0_23], %35 {strides = array<i32>} : memref<1x128xf32, #tpu.memory_space<vmem>>, vector<1x128xf32>,
      %cst_24 = arith.constant 0.000000e+00 : f32
      %37 = vector.broadcast %cst_24 : f32 to vector<1x128xf32>
      %c0_25 = arith.constant 0 : index
      %c0_26 = arith.constant 0 : index
      %38 = vector.load %arg7[%c0_25, %c0_26] : memref<1x128xf32, #tpu.memory_space<vmem>>, vector<1x128xf32>
      tpu.vector_store %arg7[%c0_25, %c0_26], %37 {strides = array<i32>} : memref<1x128xf32, #tpu.memory_space<vmem>>, vector<1x128xf32>,
    } else {
    }
    %c0 = arith.constant 0 : index
    %c0_1 = arith.constant 0 : index
    %3 = vector.load %arg2[%c0, %c0_1] : memref<8x64xf32, #tpu.memory_space<vmem>>, vector<8x64xf32>
    %4 = arith.truncf %3 : vector<8x64xf32> to vector<8x64xbf16>
    %c0_2 = arith.constant 0 : index
    %c0_3 = arith.constant 0 : index
    %5 = vector.load %arg3[%c0_2, %c0_3] : memref<64x128xbf16, #tpu.memory_space<vmem>>, vector<64x128xbf16>
    %cst = arith.constant dense<0.000000e+00> : vector<8x128xf32>
    %6 = tpu.matmul %4, %5, %cst {dimension_numbers = #tpu.dot_dimension_numbers<[1], [0], [0], [1], [0, 0, 1, 1], [], []>} : vector<8x64xbf16>, vector<64x128xbf16>, vector<8x128xf32> -> vector<8x128xf32>
    %c0_4 = arith.constant 0 : index
    %c0_5 = arith.constant 0 : index
    %7 = vector.load %arg4[%c0_4, %c0_5] : memref<1x128xf32, #tpu.memory_space<vmem>>, vector<1x128xf32>
    %8 = vector.broadcast %7 : vector<1x128xf32> to vector<8x128xf32>
    %9 = arith.addf %6, %8 : vector<8x128xf32>
    %cst_6 = arith.constant 0.000000e+00 : f32
    %10 = vector.broadcast %cst_6 : f32 to vector<8x128xf32>
    %11 = arith.maximumf %9, %10 : vector<8x128xf32>
    %12 = arith.truncf %11 : vector<8x128xf32> to vector<8x128xbf16>
    %c0_7 = arith.constant 0 : index
    %c0_8 = arith.constant 0 : index
    %13 = vector.load %arg5[%c0_7, %c0_8] : memref<8x128xbf16, #tpu.memory_space<vmem>>, vector<8x128xbf16>
    tpu.vector_store %arg5[%c0_7, %c0_8], %12 {strides = array<i32>} : memref<8x128xbf16, #tpu.memory_space<vmem>>, vector<8x128xbf16>,
    %c1_i32 = arith.constant 1 : i32
    %14 = arith.muli %arg0, %c1_i32 : i32
    %15 = arith.addi %14, %arg1 : i32
    %c8_i32 = arith.constant 8 : i32
    %16 = arith.muli %15, %c8_i32 : i32
    %17 = tpu.iota {dimensions = array<i32: 0>} : vector<8x128xi32>
    %18 = vector.broadcast %16 : i32 to vector<8x128xi32>
    %19 = arith.addi %17, %18 : vector<8x128xi32>
    %c8_i32_9 = arith.constant 8 : i32
    %20 = vector.broadcast %c8_i32_9 : i32 to vector<8x128xi32>
    %21 = arith.cmpi slt, %19, %20 : vector<8x128xi32>
    %cst_10 = arith.constant 0.000000e+00 : f32
    %22 = vector.broadcast %cst_10 : f32 to vector<8x128xf32>
    %23 = arith.select %21, %11, %22 : vector<8x128xi1>, vector<8x128xf32>
    %c0_11 = arith.constant 0 : index
    %c0_12 = arith.constant 0 : index
    %24 = vector.load %arg6[%c0_11, %c0_12] : memref<1x128xf32, #tpu.memory_space<vmem>>, vector<1x128xf32>
    %cst_13 = arith.constant dense<0.000000e+00> : vector<128xf32>
    %25 = vector.multi_reduction <add>, %23, %cst_13 [0] : vector<8x128xf32> to vector<128xf32>
    %26 = vector.shape_cast %25 : vector<128xf32> to vector<1x128xf32>
    %27 = arith.addf %24, %26 : vector<1x128xf32>
    %c0_14 = arith.constant 0 : index
    %c0_15 = arith.constant 0 : index
    %28 = vector.load %arg6[%c0_14, %c0_15] : memref<1x128xf32, #tpu.memory_space<vmem>>, vector<1x128xf32>
    tpu.vector_store %arg6[%c0_14, %c0_15], %27 {strides = array<i32>} : memref<1x128xf32, #tpu.memory_space<vmem>>, vector<1x128xf32>,
    %c0_16 = arith.constant 0 : index
    %c0_17 = arith.constant 0 : index
    %29 = vector.load %arg7[%c0_16, %c0_17] : memref<1x128xf32, #tpu.memory_space<vmem>>, vector<1x128xf32>
    %30 = arith.mulf %23, %23 : vector<8x128xf32>
    %cst_18 = arith.constant dense<0.000000e+00> : vector<128xf32>
    %31 = vector.multi_reduction <add>, %30, %cst_18 [0] : vector<8x128xf32> to vector<128xf32>
    %32 = vector.shape_cast %31 : vector<128xf32> to vector<1x128xf32>
    %33 = arith.addf %29, %32 : vector<1x128xf32>
    %c0_19 = arith.constant 0 : index
    %c0_20 = arith.constant 0 : index
    %34 = vector.load %arg7[%c0_19, %c0_20] : memref<1x128xf32, #tpu.memory_space<vmem>>, vector<1x128xf32>
    tpu.vector_store %arg7[%c0_19, %c0_20], %33 {strides = array<i32>} : memref<1x128xf32, #tpu.memory_space<vmem>>, vector<1x128xf32>,
    return
  }
  func.func @transform_0(%arg0: i32, %arg1: i32) -> (i32, i32) {
    %c1_i32 = arith.constant 1 : i32
    %0 = arith.muli %arg0, %c1_i32 : i32
    %1 = arith.addi %0, %arg1 : i32
    %c0_i32 = arith.constant 0 : i32
    %c0_i32_0 = arith.constant 0 : i32
    return %1, %c0_i32 : i32, i32
  }
  func.func @transform_1(%arg0: i32, %arg1: i32) -> (i32, i32) {
    %c0_i32 = arith.constant 0 : i32
    %c0_i32_0 = arith.constant 0 : i32
    %c0_i32_1 = arith.constant 0 : i32
    return %c0_i32, %c0_i32_0 : i32, i32
  }
  func.func @transform_2(%arg0: i32, %arg1: i32) -> (i32, i32) {
    %c0_i32 = arith.constant 0 : i32
    %c0_i32_0 = arith.constant 0 : i32
    %c0_i32_1 = arith.constant 0 : i32
    return %c0_i32, %c0_i32_0 : i32, i32
  }
  func.func @transform_3(%arg0: i32, %arg1: i32) -> (i32, i32) {
    %c1_i32 = arith.constant 1 : i32
    %0 = arith.muli %arg0, %c1_i32 : i32
    %1 = arith.addi %0, %arg1 : i32
    %c0_i32 = arith.constant 0 : i32
    %c0_i32_0 = arith.constant 0 : i32
    return %1, %c0_i32 : i32, i32
  }
  func.func @transform_4(%arg0: i32, %arg1: i32) -> (i32, i32) {
    %c0_i32 = arith.constant 0 : i32
    %c0_i32_0 = arith.constant 0 : i32
    return %arg0, %c0_i32 : i32, i32
  }
  func.func @transform_5(%arg0: i32, %arg1: i32) -> (i32, i32) {
    %c0_i32 = arith.constant 0 : i32
    %c0_i32_0 = arith.constant 0 : i32
    return %arg0, %c0_i32 : i32, i32
  }
}

module attributes {stable_mosaic.version = 11 : i64} {
  func.func @_ae_forward_kernel(%arg0: i32, %arg1: memref<8x128xbf16, #tpu.memory_space<vmem>>, %arg2: memref<1x128xf32, #tpu.memory_space<vmem>>, %arg3: memref<1x128xf32, #tpu.memory_space<vmem>>, %arg4: memref<128x64xbf16, #tpu.memory_space<vmem>>, %arg5: memref<1x64xf32, #tpu.memory_space<vmem>>, %arg6: memref<64x32xbf16, #tpu.memory_space<vmem>>, %arg7: memref<1x32xf32, #tpu.memory_space<vmem>>, %arg8: memref<32x64xbf16, #tpu.memory_space<vmem>>, %arg9: memref<1x64xf32, #tpu.memory_space<vmem>>, %arg10: memref<64x128xbf16, #tpu.memory_space<vmem>>, %arg11: memref<1x128xf32, #tpu.memory_space<vmem>>, %arg12: memref<128x64xbf16, #tpu.memory_space<vmem>>, %arg13: memref<1x64xf32, #tpu.memory_space<vmem>>, %arg14: memref<8x64xf32, #tpu.memory_space<vmem>>, %arg15: memref<8x32xf32, #tpu.memory_space<vmem>>) attributes {dimension_semantics = [#tpu.dimension_semantics<parallel>], iteration_bounds = array<i64: 1>, scalar_prefetch = 0 : i64, scratch_operands = 0 : i64, tpu.core_type = #tpu.core_type<tc>, window_params = [{transform_indices = @transform_0, window_bounds = array<i64: 8, 128>}, {pipeline_mode = #tpu.pipeline_mode<synchronous>, transform_indices = @transform_1, window_bounds = array<i64: 1, 128>}, {pipeline_mode = #tpu.pipeline_mode<synchronous>, transform_indices = @transform_2, window_bounds = array<i64: 1, 128>}, {pipeline_mode = #tpu.pipeline_mode<synchronous>, transform_indices = @transform_3, window_bounds = array<i64: 128, 64>}, {pipeline_mode = #tpu.pipeline_mode<synchronous>, transform_indices = @transform_4, window_bounds = array<i64: 1, 64>}, {pipeline_mode = #tpu.pipeline_mode<synchronous>, transform_indices = @transform_5, window_bounds = array<i64: 64, 32>}, {pipeline_mode = #tpu.pipeline_mode<synchronous>, transform_indices = @transform_6, window_bounds = array<i64: 1, 32>}, {pipeline_mode = #tpu.pipeline_mode<synchronous>, transform_indices = @transform_7, window_bounds = array<i64: 32, 64>}, {pipeline_mode = #tpu.pipeline_mode<synchronous>, transform_indices = @transform_8, window_bounds = array<i64: 1, 64>}, {pipeline_mode = #tpu.pipeline_mode<synchronous>, transform_indices = @transform_9, window_bounds = array<i64: 64, 128>}, {pipeline_mode = #tpu.pipeline_mode<synchronous>, transform_indices = @transform_10, window_bounds = array<i64: 1, 128>}, {pipeline_mode = #tpu.pipeline_mode<synchronous>, transform_indices = @transform_11, window_bounds = array<i64: 128, 64>}, {pipeline_mode = #tpu.pipeline_mode<synchronous>, transform_indices = @transform_12, window_bounds = array<i64: 1, 64>}, {transform_indices = @transform_13, window_bounds = array<i64: 8, 64>}, {transform_indices = @transform_14, window_bounds = array<i64: 8, 32>}]} {
    %c0 = arith.constant 0 : index
    %c0_0 = arith.constant 0 : index
    %0 = vector.load %arg1[%c0, %c0_0] : memref<8x128xbf16, #tpu.memory_space<vmem>>, vector<8x128xbf16>
    %1 = arith.extf %0 : vector<8x128xbf16> to vector<8x128xf32>
    %c0_1 = arith.constant 0 : index
    %c0_2 = arith.constant 0 : index
    %2 = vector.load %arg2[%c0_1, %c0_2] : memref<1x128xf32, #tpu.memory_space<vmem>>, vector<1x128xf32>
    %3 = vector.broadcast %2 : vector<1x128xf32> to vector<8x128xf32>
    %4 = arith.mulf %1, %3 : vector<8x128xf32>
    %c0_3 = arith.constant 0 : index
    %c0_4 = arith.constant 0 : index
    %5 = vector.load %arg3[%c0_3, %c0_4] : memref<1x128xf32, #tpu.memory_space<vmem>>, vector<1x128xf32>
    %6 = vector.broadcast %5 : vector<1x128xf32> to vector<8x128xf32>
    %7 = arith.addf %4, %6 : vector<8x128xf32>
    %8 = arith.truncf %7 : vector<8x128xf32> to vector<8x128xbf16>
    %c0_5 = arith.constant 0 : index
    %c0_6 = arith.constant 0 : index
    %9 = vector.load %arg4[%c0_5, %c0_6] : memref<128x64xbf16, #tpu.memory_space<vmem>>, vector<128x64xbf16>
    %cst = arith.constant dense<0.000000e+00> : vector<8x64xf32>
    %10 = tpu.matmul %8, %9, %cst {dimension_numbers = #tpu.dot_dimension_numbers<[1], [0], [0], [1], [0, 0, 1, 1], [], []>} : vector<8x128xbf16>, vector<128x64xbf16>, vector<8x64xf32> -> vector<8x64xf32>
    %c0_7 = arith.constant 0 : index
    %c0_8 = arith.constant 0 : index
    %11 = vector.load %arg5[%c0_7, %c0_8] : memref<1x64xf32, #tpu.memory_space<vmem>>, vector<1x64xf32>
    %12 = vector.broadcast %11 : vector<1x64xf32> to vector<8x64xf32>
    %13 = arith.addf %10, %12 : vector<8x64xf32>
    %cst_9 = arith.constant 0.000000e+00 : f32
    %14 = vector.broadcast %cst_9 : f32 to vector<8x64xf32>
    %15 = arith.maximumf %13, %14 : vector<8x64xf32>
    %16 = arith.truncf %15 : vector<8x64xf32> to vector<8x64xbf16>
    %c0_10 = arith.constant 0 : index
    %c0_11 = arith.constant 0 : index
    %17 = vector.load %arg6[%c0_10, %c0_11] : memref<64x32xbf16, #tpu.memory_space<vmem>>, vector<64x32xbf16>
    %cst_12 = arith.constant dense<0.000000e+00> : vector<8x32xf32>
    %18 = tpu.matmul %16, %17, %cst_12 {dimension_numbers = #tpu.dot_dimension_numbers<[1], [0], [0], [1], [0, 0, 1, 1], [], []>} : vector<8x64xbf16>, vector<64x32xbf16>, vector<8x32xf32> -> vector<8x32xf32>
    %c0_13 = arith.constant 0 : index
    %c0_14 = arith.constant 0 : index
    %19 = vector.load %arg7[%c0_13, %c0_14] : memref<1x32xf32, #tpu.memory_space<vmem>>, vector<1x32xf32>
    %20 = vector.broadcast %19 : vector<1x32xf32> to vector<8x32xf32>
    %21 = arith.addf %18, %20 : vector<8x32xf32>
    %c0_15 = arith.constant 0 : index
    %c0_16 = arith.constant 0 : index
    %22 = vector.load %arg15[%c0_15, %c0_16] : memref<8x32xf32, #tpu.memory_space<vmem>>, vector<8x32xf32>
    tpu.vector_store %arg15[%c0_15, %c0_16], %21 {strides = array<i32>} : memref<8x32xf32, #tpu.memory_space<vmem>>, vector<8x32xf32>,
    %23 = arith.truncf %21 : vector<8x32xf32> to vector<8x32xbf16>
    %c0_17 = arith.constant 0 : index
    %c0_18 = arith.constant 0 : index
    %24 = vector.load %arg8[%c0_17, %c0_18] : memref<32x64xbf16, #tpu.memory_space<vmem>>, vector<32x64xbf16>
    %cst_19 = arith.constant dense<0.000000e+00> : vector<8x64xf32>
    %25 = tpu.matmul %23, %24, %cst_19 {dimension_numbers = #tpu.dot_dimension_numbers<[1], [0], [0], [1], [0, 0, 1, 1], [], []>} : vector<8x32xbf16>, vector<32x64xbf16>, vector<8x64xf32> -> vector<8x64xf32>
    %c0_20 = arith.constant 0 : index
    %c0_21 = arith.constant 0 : index
    %26 = vector.load %arg9[%c0_20, %c0_21] : memref<1x64xf32, #tpu.memory_space<vmem>>, vector<1x64xf32>
    %27 = vector.broadcast %26 : vector<1x64xf32> to vector<8x64xf32>
    %28 = arith.addf %25, %27 : vector<8x64xf32>
    %cst_22 = arith.constant 0.000000e+00 : f32
    %29 = vector.broadcast %cst_22 : f32 to vector<8x64xf32>
    %30 = arith.maximumf %28, %29 : vector<8x64xf32>
    %31 = arith.truncf %30 : vector<8x64xf32> to vector<8x64xbf16>
    %c0_23 = arith.constant 0 : index
    %c0_24 = arith.constant 0 : index
    %32 = vector.load %arg10[%c0_23, %c0_24] : memref<64x128xbf16, #tpu.memory_space<vmem>>, vector<64x128xbf16>
    %cst_25 = arith.constant dense<0.000000e+00> : vector<8x128xf32>
    %33 = tpu.matmul %31, %32, %cst_25 {dimension_numbers = #tpu.dot_dimension_numbers<[1], [0], [0], [1], [0, 0, 1, 1], [], []>} : vector<8x64xbf16>, vector<64x128xbf16>, vector<8x128xf32> -> vector<8x128xf32>
    %c0_26 = arith.constant 0 : index
    %c0_27 = arith.constant 0 : index
    %34 = vector.load %arg11[%c0_26, %c0_27] : memref<1x128xf32, #tpu.memory_space<vmem>>, vector<1x128xf32>
    %35 = vector.broadcast %34 : vector<1x128xf32> to vector<8x128xf32>
    %36 = arith.addf %33, %35 : vector<8x128xf32>
    %cst_28 = arith.constant 0.000000e+00 : f32
    %37 = vector.broadcast %cst_28 : f32 to vector<8x128xf32>
    %38 = arith.maximumf %36, %37 : vector<8x128xf32>
    %39 = arith.truncf %38 : vector<8x128xf32> to vector<8x128xbf16>
    %c0_29 = arith.constant 0 : index
    %c0_30 = arith.constant 0 : index
    %40 = vector.load %arg12[%c0_29, %c0_30] : memref<128x64xbf16, #tpu.memory_space<vmem>>, vector<128x64xbf16>
    %cst_31 = arith.constant dense<0.000000e+00> : vector<8x64xf32>
    %41 = tpu.matmul %39, %40, %cst_31 {dimension_numbers = #tpu.dot_dimension_numbers<[1], [0], [0], [1], [0, 0, 1, 1], [], []>} : vector<8x128xbf16>, vector<128x64xbf16>, vector<8x64xf32> -> vector<8x64xf32>
    %c0_32 = arith.constant 0 : index
    %c0_33 = arith.constant 0 : index
    %42 = vector.load %arg13[%c0_32, %c0_33] : memref<1x64xf32, #tpu.memory_space<vmem>>, vector<1x64xf32>
    %43 = vector.broadcast %42 : vector<1x64xf32> to vector<8x64xf32>
    %44 = arith.addf %41, %43 : vector<8x64xf32>
    %c0_34 = arith.constant 0 : index
    %c0_35 = arith.constant 0 : index
    %45 = vector.load %arg14[%c0_34, %c0_35] : memref<8x64xf32, #tpu.memory_space<vmem>>, vector<8x64xf32>
    tpu.vector_store %arg14[%c0_34, %c0_35], %44 {strides = array<i32>} : memref<8x64xf32, #tpu.memory_space<vmem>>, vector<8x64xf32>,
    return
  }
  func.func @transform_0(%arg0: i32) -> (i32, i32) {
    %c0_i32 = arith.constant 0 : i32
    %c0_i32_0 = arith.constant 0 : i32
    return %arg0, %c0_i32 : i32, i32
  }
  func.func @transform_1(%arg0: i32) -> (i32, i32) {
    %c0_i32 = arith.constant 0 : i32
    %c0_i32_0 = arith.constant 0 : i32
    %c0_i32_1 = arith.constant 0 : i32
    return %c0_i32, %c0_i32_0 : i32, i32
  }
  func.func @transform_2(%arg0: i32) -> (i32, i32) {
    %c0_i32 = arith.constant 0 : i32
    %c0_i32_0 = arith.constant 0 : i32
    %c0_i32_1 = arith.constant 0 : i32
    return %c0_i32, %c0_i32_0 : i32, i32
  }
  func.func @transform_3(%arg0: i32) -> (i32, i32) {
    %c0_i32 = arith.constant 0 : i32
    %c0_i32_0 = arith.constant 0 : i32
    %c0_i32_1 = arith.constant 0 : i32
    return %c0_i32, %c0_i32_0 : i32, i32
  }
  func.func @transform_4(%arg0: i32) -> (i32, i32) {
    %c0_i32 = arith.constant 0 : i32
    %c0_i32_0 = arith.constant 0 : i32
    %c0_i32_1 = arith.constant 0 : i32
    return %c0_i32, %c0_i32_0 : i32, i32
  }
  func.func @transform_5(%arg0: i32) -> (i32, i32) {
    %c0_i32 = arith.constant 0 : i32
    %c0_i32_0 = arith.constant 0 : i32
    %c0_i32_1 = arith.constant 0 : i32
    return %c0_i32, %c0_i32_0 : i32, i32
  }
  func.func @transform_6(%arg0: i32) -> (i32, i32) {
    %c0_i32 = arith.constant 0 : i32
    %c0_i32_0 = arith.constant 0 : i32
    %c0_i32_1 = arith.constant 0 : i32
    return %c0_i32, %c0_i32_0 : i32, i32
  }
  func.func @transform_7(%arg0: i32) -> (i32, i32) {
    %c0_i32 = arith.constant 0 : i32
    %c0_i32_0 = arith.constant 0 : i32
    %c0_i32_1 = arith.constant 0 : i32
    return %c0_i32, %c0_i32_0 : i32, i32
  }
  func.func @transform_8(%arg0: i32) -> (i32, i32) {
    %c0_i32 = arith.constant 0 : i32
    %c0_i32_0 = arith.constant 0 : i32
    %c0_i32_1 = arith.constant 0 : i32
    return %c0_i32, %c0_i32_0 : i32, i32
  }
  func.func @transform_9(%arg0: i32) -> (i32, i32) {
    %c0_i32 = arith.constant 0 : i32
    %c0_i32_0 = arith.constant 0 : i32
    %c0_i32_1 = arith.constant 0 : i32
    return %c0_i32, %c0_i32_0 : i32, i32
  }
  func.func @transform_10(%arg0: i32) -> (i32, i32) {
    %c0_i32 = arith.constant 0 : i32
    %c0_i32_0 = arith.constant 0 : i32
    %c0_i32_1 = arith.constant 0 : i32
    return %c0_i32, %c0_i32_0 : i32, i32
  }
  func.func @transform_11(%arg0: i32) -> (i32, i32) {
    %c0_i32 = arith.constant 0 : i32
    %c0_i32_0 = arith.constant 0 : i32
    %c0_i32_1 = arith.constant 0 : i32
    return %c0_i32, %c0_i32_0 : i32, i32
  }
  func.func @transform_12(%arg0: i32) -> (i32, i32) {
    %c0_i32 = arith.constant 0 : i32
    %c0_i32_0 = arith.constant 0 : i32
    %c0_i32_1 = arith.constant 0 : i32
    return %c0_i32, %c0_i32_0 : i32, i32
  }
  func.func @transform_13(%arg0: i32) -> (i32, i32) {
    %c0_i32 = arith.constant 0 : i32
    %c0_i32_0 = arith.constant 0 : i32
    return %arg0, %c0_i32 : i32, i32
  }
  func.func @transform_14(%arg0: i32) -> (i32, i32) {
    %c0_i32 = arith.constant 0 : i32
    %c0_i32_0 = arith.constant 0 : i32
    return %arg0, %c0_i32 : i32, i32
  }
}

</mosaic_0001>

<bundles_post_ra>
// kernel: autoencoder_forward.2
= control target key start
LH: loop header
LB: loop body
LE: loop exit
PB: predicated region body
PF: predicated region fallthrough
CT: control target
= control target key end

     0   :  { %v233_v0 = vmov 0.0   ;;  %vm234_vm0 = vmmov 0   ;;  %vm93_vm1 = vcmask 523264   ;;  %s304_s1 = inlined_call_operand.vmem [shape: bf16[64,128], index: 1, kind: input, shape index: {}]   ;;  %s305_s4 = inlined_call_operand.vmem [shape: f32[1,128], index: 4, kind: output, shape index: {1}]   ;;  %s306_s5 = inlined_call_operand.vmem [shape: f32[1,128], index: 5, kind: output, shape index: {2}]   ;;  %s307_s0 = inlined_call_operand.vmem [shape: f32[8,64], index: 0, kind: input, shape index: {}]   ;;  %s308_s2 = inlined_call_operand.vmem [shape: f32[1,128], index: 2, kind: input, shape index: {}]   ;;  %s309_s3 = inlined_call_operand.vmem [shape: bf16[8,128], index: 3, kind: output, shape index: {0}]  }
   0x1   :  { %215 = vmatprep.subr.bf16.mxu0 %v233_v0  ;;  %v229_v1 = vld [vmem:[%s304_s1] sm:$0xff]   ;;  %223 = vmatprep.mubr.msk.bf16.mxu0 %vm234_vm0, %v233_v0  ;;  %50 = vst [vmem:[%s305_s4] sm:$0x1] %v233_v0  ;;  %51 = vst [vmem:[%s306_s5] sm:$0x1] %v233_v0  ;;  %v230_v2 = vld [vmem:[%s304_s1 + $0x8] sm:$0xff]  }
   0x2   :  { %216 = vmatpush3.bf16.msra.mxu0 %v229_v1  ;;  %v231_v3 = vld [vmem:[%s304_s1 + $0x10] sm:$0xff]   ;;  %v232_v4 = vld [vmem:[%s304_s1 + $0x18] sm:$0xff]   ;;  %v52_v5 = vld [vmem:[%s307_s0] sm:$0xff] }
   0x3   :  { %217 = vmatprep.subr.bf16.mxu0 %v233_v0  ;;  %v53_v6 = vpack.c.bf16 %v52_v5, %v52_v5  ;;  %v204_v7 = vld [vmem:[%s308_s2] ss:$0 sm:$0xff] }
   0x6   :  { %218 = vmatpush3.bf16.msra.mxu0 %v230_v2 }
   0x7   :  { %219 = vmatprep.subr.bf16.mxu0 %v233_v0 }
   0x8   :  { %v148_v25 = vld [vmem:[%s305_s4] sm:$0x1] }
   0x9   :  { %v157_v28 = vld [vmem:[%s306_s5] sm:$0x1] }
   0xa   :  { %220 = vmatpush3.bf16.msra.mxu0 %v231_v3 }
   0xb   :  { %221 = vmatprep.subr.bf16.mxu0 %v233_v0 }
   0xe   :  { %222 = vmatpush3.bf16.msra.mxu0 %v232_v4 }
  0x11   :  { %224 = vmatmul.mubr.msk.bf16.vlgmr.msra.gmra.mrb[0].mxu0 %vm93_vm1, %v53_v6 }
  0xe4   :  { %v131_v8 = vpop.f32.mrb[0].mxu0 }
  0xe5   :  { %v132_v9 = vadd.f32 %v204_v7, %v131_v8  ;;  %v225_v10 = vpop.f32.mrb[1].mxu0 }
  0xe6   :  { %v134_v11 = vpop.f32.mrb[2].mxu0 }
  0xe7   :  { %v137_v12 = vmax.f32 %v132_v9, 0.0  ;;  %v226_v13 = vpop.f32.mrb[3].mxu0 }
  0xe9   :  { %v138_v14 = vpack.c.bf16 %v137_v12, %v137_v12  ;;  %v149_v15 = vrot.slane %v137_v12, 4  ;;  %v158_v16 = vmul.f32 %v137_v12, %v137_v12 }
  0xeb   :  { %139 = vst [vmem:[%s309_s3] sm:$0xf] %v138_v14  ;;  %v150_v17 = vadd.f32 %v149_v15, %v137_v12  ;;  %v159_v18 = vrot.slane %v158_v16, 4 }
  0xed   :  { %v151_v19 = vrot.slane %v150_v17, 2  ;;  %v160_v20 = vadd.f32 %v159_v18, %v158_v16 }
  0xef   :  { %v152_v21 = vadd.f32 %v151_v19, %v150_v17  ;;  %v161_v22 = vrot.slane %v160_v20, 2 }
  0xf1   :  { %v153_v23 = vrot.slane %v152_v21, 1  ;;  %v162_v24 = vadd.f32 %v161_v22, %v160_v20 }
  0xf3   :  { %v154_v26 = vadd.f32 %v153_v23, %v152_v21  ;;  %v163_v27 = vrot.slane %v162_v24, 1 }
  0xf5   :  { %v155_v29 = vadd.f32 %v154_v26, %v148_v25  ;;  %v164_v30 = vadd.f32 %v163_v27, %v162_v24 }
  0xf7   :  { %156 = vst [vmem:[%s305_s4] sm:$0x1] %v155_v29  ;;  %v165_v31 = vadd.f32 %v164_v30, %v157_v28 }
  0xf9   :  { %166 = vst [vmem:[%s306_s5] sm:$0x1] %v165_v31 }

// kernel: autoencoder_forward.3
= control target key start
LH: loop header
LB: loop body
LE: loop exit
PB: predicated region body
PF: predicated region fallthrough
CT: control target
= control target key end

     0   :  { %20 = vsyncpa [#allocation3], 0  ;;  %v776_v1 = vmov 0.0   ;;  %vm777_vm0 = vmmov 0   ;;  %s1020_s0 = inlined_call_operand.vmem [shape: bf16[8,128], index: 0, kind: input, shape index: {}]   ;;  %s1021_s1 = inlined_call_operand.vmem [shape: f32[1,128], index: 1, kind: input, shape index: {}]   ;;  %s1022_s2 = inlined_call_operand.vmem [shape: f32[1,128], index: 2, kind: input, shape index: {}]   ;;  %s1023_s3 = inlined_call_operand.vmem [shape: bf16[128,64], index: 3, kind: input, shape index: {}]   ;;  %s1024_s4 = inlined_call_operand.vmem [shape: f32[1,64], index: 4, kind: input, shape index: {}]   ;;  %s1025_s5 = inlined_call_operand.vmem [shape: bf16[64,32], index: 5, kind: input, shape index: {}]   ;;  %s1026_s6 = inlined_call_operand.vmem [shape: f32[1,32], index: 6, kind: input, shape index: {}]   ;;  %s1027_s7 = inlined_call_operand.vmem [shape: bf16[32,64], index: 7, kind: input, shape index: {}]   ;;  %s1028_s8 = inlined_call_operand.vmem [shape: f32[1,64], index: 8, kind: input, shape index: {}]   ;;  %s1029_s9 = inlined_call_operand.vmem [shape: bf16[64,128], index: 9, kind: input, shape index: {}]   ;;  %s1030_s10 = inlined_call_operand.vmem [shape: f32[1,128], index: 10, kind: input, shape index: {}]   ;;  %s1031_s11 = inlined_call_operand.vmem [shape: bf16[128,64], index: 11, kind: input, shape index: {}]   ;;  %s1032_s12 = inlined_call_operand.vmem [shape: f32[1,64], index: 12, kind: input, shape index: {}]   ;;  %s1033_s13 = inlined_call_operand.hbm [shape: f32[8,64], index: 13, kind: output, shape index: {0}]   ;;  %s1034_s14 = inlined_call_operand.hbm [shape: f32[8,32], index: 14, kind: output, shape index: {1}]  }
   0x1   :  { %v702_v0 = vld [vmem:[%s1023_s3] sm:$0xff]   ;;  %626 = vmatprep.subr.bf16.mxu0 %v776_v1  ;;  %646 = vmatprep.subr.bf16.mxu1 %v776_v1  ;;  %v703_v2 = vld [vmem:[%s1023_s3 + $0x8] sm:$0xff]   ;;  %v704_v3 = vld [vmem:[%s1023_s3 + $0x10] sm:$0xff]  }
   0x2   :  { %627 = vmatpush3.bf16.msra.mxu0 %v702_v0  ;;  %642 = vmatprep.mubr.msk.bf16.mxu0 %vm777_vm0, %v776_v1  ;;  %v710_v4 = vld [vmem:[%s1025_s5] sm:$0xff]   ;;  %v705_v5 = vld [vmem:[%s1023_s3 + $0x18] sm:$0xff]   ;;  %v711_v6 = vld [vmem:[%s1025_s5 + $0x8] sm:$0xff]  }
   0x3   :  { %628 = vmatprep.subr.bf16.mxu0 %v776_v1  ;;  %654 = vmatprep.mubr.msk.bf16.mxu1 %vm777_vm0, %v776_v1  ;;  %v706_v7 = vld [vmem:[%s1023_s3 + $0x20] sm:$0xff]   ;;  %v707_v9 = vld [vmem:[%s1023_s3 + $0x28] sm:$0xff]   ;;  %v708_v13 = vld [vmem:[%s1023_s3 + $0x30] sm:$0xff]  }
   0x4   :  { %647 = vmatpush3.bf16.msra.mxu1 %v710_v4  ;;  %v49_v8 = vld [vmem:[%s1020_s0] sm:$0xf] }
   0x5   :  { %648 = vmatprep.subr.bf16.mxu1 %v776_v1  ;;  %v559_v10 = vld [vmem:[%s1021_s1] ss:$0 sm:$0xff]  ;;  %v50_v11 = vunpack.c.l.bf16 %v49_v8 }
   0x6   :  { %629 = vmatpush3.bf16.msra.mxu0 %v703_v2  ;;  %v560_v14 = vld [vmem:[%s1022_s2] ss:$0 sm:$0xff] }
   0x7   :  { %630 = vmatprep.subr.bf16.mxu0 %v776_v1  ;;  %v58_v12 = vmul.f32 %v559_v10, %v50_v11 }
   0x8   :  { %649 = vmatpush3.bf16.msra.mxu1 %v711_v6 }
   0x9   :  { %650 = vmatprep.subr.bf16.mxu1 %v776_v1 }
   0xa   :  { %631 = vmatpush3.bf16.msra.mxu0 %v704_v3 }
   0xb   :  { %632 = vmatprep.subr.bf16.mxu0 %v776_v1 }
   0xe   :  { %633 = vmatpush3.bf16.msra.mxu0 %v705_v5 }
   0xf   :  { %634 = vmatprep.subr.bf16.mxu0 %v776_v1 }
  0x12   :  { %635 = vmatpush3.bf16.msra.mxu0 %v706_v7 }
  0x13   :  { %636 = vmatprep.subr.bf16.mxu0 %v776_v1 }
  0x16   :  { %637 = vmatpush3.bf16.msra.mxu0 %v707_v9 }
  0x17   :  { %21 = vsyncpa [#allocation5], 0  ;;  %638 = vmatprep.subr.bf16.mxu0 %v776_v1  ;;  %v66_v15 = vadd.f32 %v560_v14, %v58_v12  ;;  %v709_v16 = vld [vmem:[%s1023_s3 + $0x38] sm:$0xff]   ;;  %v712_v18 = vld [vmem:[%s1025_s5 + $0x10] sm:$0xff]   ;;  %vm220_vm1 = vcmask 523264   ;;  %vm264_vm2 = vcmask 261120  }
  0x18   :  { %651 = vmatpush3.bf16.msra.mxu1 %v712_v18  ;;  %v713_v19 = vld [vmem:[%s1025_s5 + $0x18] sm:$0xff]   ;;  %v561_v20 = vld [vmem:[%s1024_s4] ss:$0 sm:$0xff]  ;;  %v715_v29 = vld [vmem:[%s1027_s7 + $0x8] sm:$0xff]  }
  0x19   :  { %v67_v17 = vpack.c.bf16 %v66_v15, %v66_v15  ;;  %652 = vmatprep.subr.bf16.mxu1 %v776_v1  ;;  %v714_v27 = vld [vmem:[%s1027_s7] sm:$0xff]   ;;  %v717_v38 = vld [vmem:[%s1029_s9 + $0x8] sm:$0xff]   ;;  %v718_v39 = vld [vmem:[%s1029_s9 + $0x10] sm:$0xff]   ;;  %s778_s7 = smov [#allocation4]  }
  0x1a   :  { %639 = vmatpush3.bf16.msra.mxu0 %v708_v13  ;;  %v570_v30 = vld [vmem:[%s1026_s6] ss:$0 sm:$0xff]  ;;  %v719_v40 = vld [vmem:[%s1029_s9 + $0x18] sm:$0xff]   ;;  %v721_v42 = vld [vmem:[%s1031_s11 + $0x8] sm:$0xff]   ;;  %s547_s15 = sshll.u32 %s778_s7, 4  ;;  %s548_s15 = int_to_ptr.vmem [resolvable:$true] %s547_s15 }
  0x1b   :  { %640 = vmatprep.subr.bf16.mxu0 %v776_v1  ;;  %v716_v35 = vld [vmem:[%s1029_s9] sm:$0xff]   ;;  %v722_v43 = vld [vmem:[%s1031_s11 + $0x10] sm:$0xff]   ;;  %v723_v44 = vld [vmem:[%s1031_s11 + $0x18] sm:$0xff]   ;;  %s728_s6 = scalar_lea.vmem %s548_s15, 128  ;;  %p733_p1 = scmp.lt.s32.totalorder %s548_s15, %s548_s15 }
  0x1c   :  { %653 = vmatpush3.bf16.msra.mxu1 %v713_v19  ;;  %v720_v41 = vld [vmem:[%s1031_s11] sm:$0xff]   ;;  %v725_v46 = vld [vmem:[%s1031_s11 + $0x28] sm:$0xff]   ;;  %v726_v55 = vld [vmem:[%s1031_s11 + $0x30] sm:$0xff]   ;;  %p729_p0 = scmp.ne.s32.totalorder %s548_s15, %s728_s6  ;;  %p734_p2 = scmp.lt.s32.totalorder %s728_s6, %s728_s6 }
  0x1d   :  { %658 = vmatprep.subr.bf16.mxu1 %v776_v1  ;;  %v724_v45 = vld [vmem:[%s1031_s11 + $0x20] sm:$0xff]   ;;  %v727_v56 = vld [vmem:[%s1031_s11 + $0x38] sm:$0xff]  }
  0x1e   :  { %641 = vmatpush3.bf16.msra.mxu0 %v709_v16  ;;  %v576_v47 = vld [vmem:[%s1028_s8] ss:$0 sm:$0xff]  ;;  %p735_p3 = por %p734_p2, %p733_p1 }
  0x1f   :  { %678 = vmatprep.subr.bf16.mxu0 %v776_v1  ;;  %v580_v57 = vld [vmem:[%s1030_s10] ss:$0 sm:$0xff] }
  0x20   :  { %p736_p4 = pnand %p735_p3, %p729_p0 }
  0x21   :  { %643 = vmatmul.mubr.bf16.vlgmr.msra.gmra.mrb[0].mxu0 %v67_v17 }
  0x22   :  { %694 = vmatprep.mubr.msk.bf16.mxu0 %vm777_vm0, %v776_v1  ;;  %679 = vmatpush3.bf16.msra.mxu0 %v720_v41 }
  0x23   :  { %680 = vmatprep.subr.bf16.mxu0 %v776_v1 }
  0x26   :  { %681 = vmatpush3.bf16.msra.mxu0 %v721_v42 }
  0x27   :  { %682 = vmatprep.subr.bf16.mxu0 %v776_v1 }
  0x2a   :  { %683 = vmatpush3.bf16.msra.mxu0 %v722_v43 }
  0x2b   :  { %684 = vmatprep.subr.bf16.mxu0 %v776_v1 }
  0x2e   :  { %685 = vmatpush3.bf16.msra.mxu0 %v723_v44 }
  0x2f   :  { %686 = vmatprep.subr.bf16.mxu0 %v776_v1 }
  0x32   :  { %687 = vmatpush3.bf16.msra.mxu0 %v724_v45 }
  0x33   :  { %688 = vmatprep.subr.bf16.mxu0 %v776_v1 }
  0x36   :  { %689 = vmatpush3.bf16.msra.mxu0 %v725_v46 }
  0x37   :  { %690 = vmatprep.subr.bf16.mxu0 %v776_v1 }
  0x3a   :  { %691 = vmatpush3.bf16.msra.mxu0 %v726_v55 }
  0x3b   :  { %692 = vmatprep.subr.bf16.mxu0 %v776_v1 }
  0x3e   :  { %693 = vmatpush3.bf16.msra.mxu0 %v727_v56 }
  0xf4   :  { %v173_v21 = vpop.f32.mrb[0].mxu0 }
  0xf5   :  { %v174_v22 = vadd.f32 %v561_v20, %v173_v21  ;;  %v644_v23 = vpop.f32.mrb[1].mxu0 }
  0xf6   :  { %v176_v24 = vpop.f32.mrb[2].mxu0 }
  0xf7   :  { %v179_v25 = vmax.f32 %v174_v22, 0.0  ;;  %v645_v26 = vpop.f32.mrb[3].mxu0 }
  0xf9   :  { %v180_v28 = vpack.c.bf16 %v179_v25, %v179_v25 }
  0xfb   :  { %655 = vmatmul.mubr.msk.bf16.vlgmr.msra.gmra.mrb[0].mxu1 %vm220_vm1, %v180_v28 }
  0xfc   :  { %659 = vmatpush3.bf16.msra.mxu1 %v714_v27  ;;  %662 = vmatprep.mubr.msk.bf16.mxu1 %vm777_vm0, %v776_v1 }
  0xfd   :  { %660 = vmatprep.subr.bf16.mxu1 %v776_v1 }
 0x100   :  { %661 = vmatpush3.bf16.msra.mxu1 %v715_v29 }
 0x101   :  { %666 = vmatprep.subr.bf16.mxu1 %v776_v1 }
 0x1ce   :  { %v258_v31 = vpop.f32.mrb[0].mxu1 }
 0x1cf   :  { %v259_v32 = vadd.f32 %v570_v30, %v258_v31  ;;  %v656_v33 = vpop.f32.mrb[1].mxu1 }
 0x1d0   :  { %v261_v34 = vpop.f32.mrb[2].mxu1 }
 0x1d1   :  { %v266_v36 = vpack.c.bf16 %v259_v32, %v259_v32  ;;  %v657_v37 = vpop.f32.mrb[3].mxu1  ;;  %265 = vst.msk [vmem:[#allocation4] sm:$0xff] %vm264_vm2, %v259_v32 }
 0x1d3   :  { %663 = vmatmul.mubr.msk.bf16.vlgmr.msra.gmra.mrb[4].mxu1 %vm264_vm2, %v266_v36 }
 0x1d4   :  { %667 = vmatpush3.bf16.msra.mxu1 %v716_v35  ;;  %674 = vmatprep.mubr.msk.bf16.mxu1 %vm777_vm0, %v776_v1 }
 0x1d5   :  { %668 = vmatprep.subr.bf16.mxu1 %v776_v1 }
 0x1d8   :  { %669 = vmatpush3.bf16.msra.mxu1 %v717_v38 }
 0x1d9   :  { %670 = vmatprep.subr.bf16.mxu1 %v776_v1 }
 0x1dc   :  { %671 = vmatpush3.bf16.msra.mxu1 %v718_v39 }
 0x1dd   :  { %672 = vmatprep.subr.bf16.mxu1 %v776_v1 }
 0x1e0   :  { %673 = vmatpush3.bf16.msra.mxu1 %v719_v40 }
 0x2a6   :  { %v327_v48 = vpop.f32.mrb[4].mxu1 }
 0x2a7   :  { %v328_v49 = vadd.f32 %v576_v47, %v327_v48  ;;  %v664_v50 = vpop.f32.mrb[5].mxu1 }
 0x2a8   :  { %v330_v51 = vpop.f32.mrb[6].mxu1 }
 0x2a9   :  { %v333_v52 = vmax.f32 %v328_v49, 0.0  ;;  %v665_v53 = vpop.f32.mrb[7].mxu1 }
 0x2ab   :  { %v334_v54 = vpack.c.bf16 %v333_v52, %v333_v52 }
 0x2ad   :  { %675 = vmatmul.mubr.msk.bf16.vlgmr.msra.gmra.mrb[8].mxu1 %vm220_vm1, %v334_v54 }
 0x380   :  { %v411_v58 = vpop.f32.mrb[8].mxu1 }
 0x381   :  { %v412_v59 = vadd.f32 %v580_v57, %v411_v58  ;;  %v676_v60 = vpop.f32.mrb[9].mxu1 }
 0x382   :  { %v414_v61 = vpop.f32.mrb[10].mxu1 }
 0x383   :  { %v417_v62 = vmax.f32 %v412_v59, 0.0  ;;  %v677_v63 = vpop.f32.mrb[11].mxu1 }
 0x385   :  { %v418_v0 = vpack.c.bf16 %v417_v62, %v417_v62 }
 0x387   :  { %695 = vmatmul.mubr.bf16.vlgmr.msra.gmra.mrb[4].mxu0 %v418_v0 }
 0x388   :  { %739 = shalt.err (!%p736_p4)
}
 0x389   :  { %s740_s16 = scalar_lea.hbm %s1034_s14, 128 }
 0x38a   :  { %p741_p5 = scmp.ne.s32.totalorder %s1034_s14, %s740_s16  ;;  %p744_p6 = scmp.lt.u32.totalorder %s740_s16, %s1034_s14 }
 0x38c   :  { %p746_p7 = pnand %p744_p6, %p741_p5 }
 0x38e   :  { %749 = shalt.err (!%p746_p7)
}
 0x38f   :  { %550 = dma.vmem_to_hbm [thread:$0]  %s548_s15, 128, %s1034_s14, [#allocation5]   ;;  %v586_v1 = vld [vmem:[%s1032_s12] ss:$0 sm:$0xff] }
 0x390   :  { %s779_s9 = smov [#allocation2]  }
 0x391   :  { %s537_s22 = sshll.u32 %s779_s9, 4  ;;  %s538_s22 = int_to_ptr.vmem [resolvable:$true] %s537_s22 }
 0x392   :  { %s750_s23 = scalar_lea.vmem %s538_s22, 128  ;;  %p755_p9 = scmp.lt.s32.totalorder %s538_s22, %s538_s22 }
 0x393   :  { %p751_p8 = scmp.ne.s32.totalorder %s538_s22, %s750_s23  ;;  %p756_p10 = scmp.lt.s32.totalorder %s750_s23, %s750_s23 }
 0x395   :  { %p757_p11 = por %p756_p10, %p755_p9 }
 0x397   :  { %p758_p12 = pnand %p757_p11, %p751_p8 }
 0x45a   :  { %v524_v2 = vpop.f32.mrb[4].mxu0 }
 0x45b   :  { %v525_v3 = vadd.f32 %v586_v1, %v524_v2  ;;  %v696_v4 = vpop.f32.mrb[5].mxu0 }
 0x45c   :  { %v527_v5 = vpop.f32.mrb[6].mxu0 }
 0x45d   :  { %530 = vst.msk [vmem:[#allocation2] sm:$0xff] %vm220_vm1, %v525_v3  ;;  %v697_v6 = vpop.f32.mrb[7].mxu0 }
 0x45e   :  { %761 = shalt.err (!%p758_p12)
}
 0x45f   :  { %s762_s12 = scalar_lea.hbm %s1033_s13, 128 }
 0x460   :  { %p763_p13 = scmp.ne.s32.totalorder %s1033_s13, %s762_s12  ;;  %p766_p0 = scmp.lt.u32.totalorder %s762_s12, %s1033_s13 }
 0x462   :  { %p768_p1 = pnand %p766_p0, %p763_p13 }
 0x464   :  { %771 = shalt.err (!%p768_p1)
}
 0x465   :  { %540 = dma.vmem_to_hbm [thread:$0]  %s538_s22, 128, %s1033_s13, [#allocation3]  }
 0x466   :  { %772 = dma.done.wait [#allocation3], 128  }
 0x467   :  { %773 = vsyncadd [#allocation3], 4294967168 }
 0x468   :  { %774 = dma.done.wait [#allocation5], 128  }
 0x469   :  { %775 = vsyncadd [#allocation5], 4294967168 }
 0x46a   :  { %557 = vsyncpa [#allocation3], 1 }
 0x46b   :  { %558 = vsyncpa [#allocation5], 1 }

</bundles_post_ra>
